<compile_context>
chip_gen: v6e
topology: v6e:2x2x1
jax: 0.10.0
libtpu: 0.0.40
codegen_flags: <defaults>
</compile_context>

<pallas_src>
import functools

import jax
import jax.numpy as jnp
from jax.experimental import pallas as pl
from jax.experimental.pallas import tpu as pltpu

LN_EPS = 0.001  # LayerNormalization eps


def _round_up(x, m):
    return ((x + m - 1) // m) * m


# --------------------------------------------------------------------------
# Kernels
# --------------------------------------------------------------------------
def encode_kernel(xin_ref, invl_ref, invr_ref, wbig_ref, bbig_ref, bgl_ref,
                  bgr_ref, wp1_ref, bp1_ref, wp2_ref, bp2_ref, lna_ref,
                  lnb_ref, g_ref):
    """Fused neighbor/entity encoders + SupportEncoder for a block of rows.

    xin layout per row: [left_sum/ldeg | e1 | e2 | right_sum/rdeg | zero pad].
    wbig is block-diagonal(WgT, W1T, W2T, WgT); the neighbor bias (200/deg)*bg
    is applied as two per-row VPU FMAs against resident [1,128] bias rows.
    """
    pre = jnp.dot(xin_ref[...], wbig_ref[...],
                  preferred_element_type=jnp.float32)
    pre = (pre + bbig_ref[...]
           + invl_ref[...] * bgl_ref[...]      # (200/ldeg) * bg in lanes 0:D
           + invr_ref[...] * bgr_ref[...])     # (200/rdeg) * bg in lanes 3D:4D
    x = jnp.tanh(pre)                          # f32 elementwise (v5e-safe)

    # SupportEncoder: relu(proj1(x)) -> proj2 -> dropout(identity) -> +residual
    h = jnp.maximum(
        jnp.dot(x.astype(wp1_ref.dtype), wp1_ref[...],
                preferred_element_type=jnp.float32) + bp1_ref[...], 0.0)
    y = (jnp.dot(h.astype(wp2_ref.dtype), wp2_ref[...],
                 preferred_element_type=jnp.float32) + bp2_ref[...] + x)

    # LayerNormalization (torch.std = unbiased n-1 estimator; eps added to sigma).
    mu = jnp.mean(y, axis=-1, keepdims=True)
    d = y - mu
    sig = jnp.sqrt(jnp.sum(d * d, axis=-1, keepdims=True)
                   / (y.shape[-1] - 1)) + LN_EPS
    inv = pl.reciprocal(sig, approx=True)      # EUP, off the VALU
    inv = inv * (2.0 - sig * inv)              # one Newton step -> f32 accuracy
    g_ref[...] = (d * inv * lna_ref[...] + lnb_ref[...]).astype(g_ref.dtype)


def head_kernel(qg_ref, smean_ref, wl_ref, bl_ref, out_ref, *, match_lane):
    """Lane-dense head: lanes 0..L-1 = log_softmax(logit_), lane L = matching."""
    qg = qg_ref[...]
    match = jnp.sum(qg * smean_ref[...], axis=-1, keepdims=True)          # [TB,1]
    logits = (jnp.dot(qg, wl_ref[...], preferred_element_type=jnp.float32)
              + bl_ref[...])                                              # [TB,128]
    m = jnp.max(logits, axis=-1, keepdims=True)       # pad lanes biased to -1e30
    lse = jnp.log(jnp.sum(jnp.exp(logits - m), axis=-1, keepdims=True))
    logp = logits - m - lse
    lane = jax.lax.broadcasted_iota(jnp.int32, logits.shape, 1)
    out_ref[...] = jnp.where(lane == match_lane, match, logp).astype(out_ref.dtype)


# --------------------------------------------------------------------------
# pallas_call wrappers
# --------------------------------------------------------------------------
def _encode_pallas(xin, invl, invr, wbig, bbig, bgl, bgr,
                   wp1, bp1, wp2, bp2, lna, lnb, *, block_rows):
    NP, KP = xin.shape
    S1 = wbig.shape[1]
    assert NP % block_rows == 0

    def resident(arr):  # weights / biases: same block every grid step
        return pl.BlockSpec(arr.shape, lambda i: (0, 0))

    return pl.pallas_call(
        encode_kernel,
        out_shape=jax.ShapeDtypeStruct((NP, S1), jnp.float32),
        grid=(NP // block_rows,),
        in_specs=[
            pl.BlockSpec((block_rows, KP), lambda i: (i, 0)),
            pl.BlockSpec((block_rows, 1), lambda i: (i, 0)),
            pl.BlockSpec((block_rows, 1), lambda i: (i, 0)),
            resident(wbig), resident(bbig), resident(bgl), resident(bgr),
            resident(wp1), resident(bp1), resident(wp2), resident(bp2),
            resident(lna), resident(lnb),
        ],
        out_specs=pl.BlockSpec((block_rows, S1), lambda i: (i, 0)),
        compiler_params=pltpu.CompilerParams(
            dimension_semantics=("parallel",)),
    )(xin, invl, invr, wbig, bbig, bgl, bgr, wp1, bp1, wp2, bp2, lna, lnb)


def _head_pallas(query_g, smean, wl_pad, bl_pad, match_lane, *, block_rows=512):
    Bq, S1 = query_g.shape
    LP = wl_pad.shape[1]
    tb = min(block_rows, _round_up(Bq, 8))
    Bp = _round_up(Bq, tb)
    qg = jnp.pad(query_g, ((0, Bp - Bq), (0, 0)))

    def resident(arr):
        return pl.BlockSpec(arr.shape, lambda i: (0, 0))

    out = pl.pallas_call(
        functools.partial(head_kernel, match_lane=match_lane),
        out_shape=jax.ShapeDtypeStruct((Bp, LP), jnp.float32),
        grid=(Bp // tb,),
        in_specs=[pl.BlockSpec((tb, S1), lambda i: (i, 0)),
                  resident(smean), resident(wl_pad), resident(bl_pad)],
        out_specs=pl.BlockSpec((tb, LP), lambda i: (i, 0)),
        compiler_params=pltpu.CompilerParams(
            dimension_semantics=("parallel",)),
    )(qg, smean, wl_pad, bl_pad)
    return out[:Bq, match_lane], out[:Bq, :match_lane]


def _fuse_first_stage(WgT, bg, W1T, b1, W2T, b2, KP):
    """Block-diagonal(WgT, W1T, W2T, WgT), K padded to KP; separate bias rows."""
    E, D = WgT.shape
    S1 = 4 * D
    W = jnp.zeros((KP, S1), jnp.float32)
    W = W.at[0:E, 0:D].set(WgT)
    W = W.at[E:2 * E, D:2 * D].set(W1T)
    W = W.at[2 * E:3 * E, 2 * D:3 * D].set(W2T)
    W = W.at[3 * E:4 * E, 3 * D:4 * D].set(WgT)
    bbig = jnp.concatenate(
        [jnp.zeros((D,), jnp.float32), b1, b2,
         jnp.zeros((D,), jnp.float32)])[None, :]
    bgl = jnp.zeros((1, S1), jnp.float32).at[0, 0:D].set(bg)
    bgr = jnp.zeros((1, S1), jnp.float32).at[0, 3 * D:4 * D].set(bg)
    return W, bbig, bgl, bgr


def extractor_forward(query, support, query_meta, support_meta, p, *,
                      block_rows=256, use_bf16=True):
    """Returns (query_g, matching_scores, log_softmax(logit_(query_g)))."""
    emb = p["emb"]
    D = p["WgT"].shape[1]
    S1 = 4 * D
    assert S1 % 128 == 0, "sp_dim1 must be a multiple of 128 for lane-dense tiles"
    NBR = query_meta[0].shape[1]
    k_nbr = jnp.float32(NBR)

    # --- XLA side: embedding gathers + neighbor-embedding sums (arbitrary gather)
    def nbr_sum(conn):
        return emb[conn[:, :, 1]].sum(axis=1)            # (rows, E)

    def build_rows(pairs, lconn, ldeg, rconn, rdeg):
        e1, e2 = emb[pairs[:, 0]], emb[pairs[:, 1]]
        ldeg = ldeg.astype(jnp.float32)[:, None]
        rdeg = rdeg.astype(jnp.float32)[:, None]
        x = jnp.concatenate(
            [nbr_sum(lconn) / ldeg, e1, e2, nbr_sum(rconn) / rdeg], axis=-1)
        return x, k_nbr / ldeg, k_nbr / rdeg

    q_lc, q_ld, q_rc, q_rd = query_meta
    s_lc, s_ld, s_rc, s_rd = support_meta
    q_rows, q_il, q_ir = build_rows(query, q_lc, q_ld, q_rc, q_rd)
    s_rows, s_il, s_ir = build_rows(support, s_lc, s_ld, s_rc, s_rd)

    xin = jnp.concatenate([q_rows, s_rows], axis=0)       # (N, 4E)
    invl = jnp.concatenate([q_il, s_il], axis=0)          # (N, 1)
    invr = jnp.concatenate([q_ir, s_ir], axis=0)

    Bq = query.shape[0]
    N, K0 = xin.shape
    KP = _round_up(K0, 128)                               # lane-dense K (=256 here)
    sub = 16 if use_bf16 else 8                           # sublane tile per dtype
    # Big row tiles for the MXU, but keep the grid >= 2 when rows allow (v7x 2 TCs).
    tb = min(block_rows, max(sub, _round_up(-(-N // 2), sub)))
    NP = _round_up(N, tb)
    xin = jnp.pad(xin, ((0, NP - N), (0, KP - K0)))
    invl = jnp.pad(invl, ((0, NP - N), (0, 0)))
    invr = jnp.pad(invr, ((0, NP - N), (0, 0)))

    wbig, bbig, bgl, bgr = _fuse_first_stage(
        p["WgT"], p["bg"], p["W1T"], p["b1"], p["W2T"], p["b2"], KP)

    mx_dtype = jnp.bfloat16 if use_bf16 else jnp.float32  # MXU operands only
    xin = xin.astype(mx_dtype)
    wbig = wbig.astype(mx_dtype)
    wp1 = p["Wp1T"].astype(mx_dtype)
    wp2 = p["Wp2T"].astype(mx_dtype)

    g = _encode_pallas(
        xin, invl, invr, wbig, bbig, bgl, bgr,
        wp1, p["bp1"][None, :], wp2, p["bp2"][None, :],
        p["ln_a"][None, :], p["ln_b"][None, :],
        block_rows=tb)

    g = g[:N]                                             # drop row padding (free)
    query_g = g[:Bq]
    support_mean = jnp.mean(g[Bq:], axis=0, keepdims=True)

    # Lane-dense head weight slab: cols 0..L-1 real logits, rest masked via -1e30 bias.
    L = p["bl"].shape[0]
    LP = _round_up(L + 1, 128)
    wl_pad = jnp.zeros((S1, LP), jnp.float32).at[:, :L].set(p["WlT"])
    bl_pad = jnp.full((1, LP), -1e30, jnp.float32).at[0, :L].set(p["bl"])

    match, logp = _head_pallas(query_g, support_mean, wl_pad, bl_pad, L)
    return query_g, match, logp


# --------------------------------------------------------------------------
# Parameters & pure-JAX reference (mirrors the PyTorch op order)
# --------------------------------------------------------------------------
def init_params(key, num_symbols, embed_dim, latent_dim_size,
                sp_dim1, sp_dim2, ep_dim, label_nums):
    D = embed_dim // latent_dim_size
    assert sp_dim1 == 4 * D and ep_dim == sp_dim1
    ks = jax.random.split(key, 13)

    def linear(kw, kb, fin, fout):
        bound = 1.0 / float(fin) ** 0.5
        w = jax.random.uniform(kw, (fin, fout), jnp.float32, -bound, bound)
        b = jax.random.uniform(kb, (fout,), jnp.float32, -bound, bound)
        return w, b

    emb = 0.1 * jax.random.normal(ks[0], (num_symbols + 1, embed_dim), jnp.float32)
    WgT, bg = linear(ks[1], ks[2], embed_dim, D)
    W1T, b1 = linear(ks[3], ks[4], embed_dim, D)
    W2T, b2 = linear(ks[5], ks[6], embed_dim, D)
    Wp1T, bp1 = linear(ks[7], ks[8], sp_dim1, sp_dim2)
    Wp2T, bp2 = linear(ks[9], ks[10], sp_dim2, sp_dim1)
    WlT, bl = linear(ks[11], ks[12], ep_dim, label_nums)
    return dict(emb=emb, WgT=WgT, bg=bg, W1T=W1T, b1=b1, W2T=W2T, b2=b2,
                Wp1T=Wp1T, bp1=bp1, Wp2T=Wp2T, bp2=bp2,
                ln_a=jnp.ones((sp_dim1,), jnp.float32),
                ln_b=jnp.zeros((sp_dim1,), jnp.float32),
                WlT=WlT, bl=bl)


def reference_forward(query, support, query_meta, support_meta, p):
    emb = p["emb"]

    def neighbor_encoder(conn, deg):
        e = emb[conn[:, :, 1]]                       # (rows, NBR, E)
        out = e @ p["WgT"] + p["bg"]                 # per-neighbor linear (torch order)
        out = jnp.sum(out, axis=1) / deg.astype(jnp.float32)[:, None]
        return jnp.tanh(out)

    def entity_encoder(e1, e2):
        return jnp.tanh(jnp.concatenate(
            [e1 @ p["W1T"] + p["b1"], e2 @ p["W2T"] + p["b2"]], axis=-1))

    def support_encoder(x):
        h = jnp.maximum(x @ p["Wp1T"] + p["bp1"], 0.0)
        y = h @ p["Wp2T"] + p["bp2"] + x
        mu = jnp.mean(y, axis=-1, keepdims=True)
        sigma = jnp.sqrt(jnp.sum((y - mu) ** 2, axis=-1, keepdims=True)
                         / (y.shape[-1] - 1))
        return (y - mu) / (sigma + LN_EPS) * p["ln_a"] + p["ln_b"]

    q_lc, q_ld, q_rc, q_rd = query_meta
    s_lc, s_ld, s_rc, s_rd = support_meta

    q_e = entity_encoder(emb[query[:, 0]], emb[query[:, 1]])
    s_e = entity_encoder(emb[support[:, 0]], emb[support[:, 1]])
    q_nb = jnp.concatenate(
        [neighbor_encoder(q_lc, q_ld), q_e, neighbor_encoder(q_rc, q_rd)], axis=-1)
    s_nb = jnp.concatenate(
        [neighbor_encoder(s_lc, s_ld), s_e, neighbor_encoder(s_rc, s_rd)], axis=-1)

    support_g = jnp.mean(support_encoder(s_nb), axis=0, keepdims=True)
    query_g = support_encoder(q_nb)
    matching = (query_g @ support_g.T)[:, 0]
    logp = jax.nn.log_softmax(query_g @ p["WlT"] + p["bl"], axis=1)
    return query_g, matching, logp


# --------------------------------------------------------------------------
if __name__ == "__main__":
    NUM_SYMBOLS = 100
    EMBED_DIM = 64
    LATENT = 2
    D_LAT = EMBED_DIM // LATENT      # 32
    SP_DIM1 = 4 * D_LAT              # 128 (lane-dense)
    SP_DIM2 = 256
    EP_DIM = SP_DIM1
    LABELS = 8
    B, FEW, NBR = 8, 3, 200

    key = jax.random.PRNGKey(0)
    k_p, k_q, k_s, k_qm, k_sm = jax.random.split(key, 5)
    params = init_params(k_p, NUM_SYMBOLS, EMBED_DIM, LATENT,
                         SP_DIM1, SP_DIM2, EP_DIM, LABELS)

    query = jax.random.randint(k_q, (B, 2), 0, NUM_SYMBOLS)
    support = jax.random.randint(k_s, (FEW, 2), 0, NUM_SYMBOLS)

    def rand_meta(k, rows):
        k1, k2, k3, k4 = jax.random.split(k, 4)
        lc = jax.random.randint(k1, (rows, NBR, 2), 0, NUM_SYMBOLS + 1)
        ld = jax.random.randint(k2, (rows,), 1, NBR + 1).astype(jnp.float32)
        rc = jax.random.randint(k3, (rows, NBR, 2), 0, NUM_SYMBOLS + 1)
        rd = jax.random.randint(k4, (rows,), 1, NBR + 1).astype(jnp.float32)
        return lc, ld, rc, rd

    query_meta = rand_meta(k_qm, B)
    support_meta = rand_meta(k_sm, FEW)

    fwd = jax.jit(extractor_forward, static_argnames=("block_rows", "use_bf16"))

    # Performance path: bf16 MXU operands, f32 accumulation / elementwise.
    qg_bf, match_bf, logp_bf = jax.block_until_ready(
        fwd(query, support, query_meta, support_meta, params,
            block_rows=256, use_bf16=True))
    # Pure-f32 path for tight numerical validation.
    qg_f32, match_f32, logp_f32 = jax.block_until_ready(
        fwd(query, support, query_meta, support_meta, params,
            block_rows=256, use_bf16=False))

    assert qg_bf.shape == (B, SP_DIM1)
    assert match_bf.shape == (B,)
    assert logp_bf.shape == (B, LABELS)

    rqg, rms, rlp = reference_forward(query, support, query_meta, support_meta, params)

    def ok(a, b, atol, rtol):
        return bool(jnp.allclose(a, b, atol=atol, rtol=rtol))

    # Tight check on the f32 path.
    assert ok(qg_f32, rqg, 5e-3, 5e-3), "query_g mismatch (f32)"
    assert ok(match_f32, rms, 5e-3, 5e-3), "matching_scores mismatch (f32)"
    assert ok(logp_f32, rlp, 5e-3, 5e-3), "log_softmax mismatch (f32)"
    # Sanity check on the bf16-operand path (f32 accumulation).
    assert ok(qg_bf, rqg, 1e-1, 5e-2), "query_g mismatch (bf16)"
    assert ok(match_bf, rms, 5e-1, 5e-2), "matching_scores mismatch (bf16)"
    assert ok(logp_bf, rlp, 1e-1, 5e-2), "log_softmax mismatch (bf16)"

    print("KERNEL_OK")
</pallas_src>

<mosaic_0001>
module attributes {stable_mosaic.version = 11 : i64} {
  func.func @encode_kernel(%arg0: i32, %arg1: memref<16x256xbf16, #tpu.memory_space<vmem>>, %arg2: memref<16x1xf32, #tpu.memory_space<vmem>>, %arg3: memref<16x1xf32, #tpu.memory_space<vmem>>, %arg4: memref<256x128xbf16, #tpu.memory_space<vmem>>, %arg5: memref<1x128xf32, #tpu.memory_space<vmem>>, %arg6: memref<1x128xf32, #tpu.memory_space<vmem>>, %arg7: memref<1x128xf32, #tpu.memory_space<vmem>>, %arg8: memref<128x256xbf16, #tpu.memory_space<vmem>>, %arg9: memref<1x256xf32, #tpu.memory_space<vmem>>, %arg10: memref<256x128xbf16, #tpu.memory_space<vmem>>, %arg11: memref<1x128xf32, #tpu.memory_space<vmem>>, %arg12: memref<1x128xf32, #tpu.memory_space<vmem>>, %arg13: memref<1x128xf32, #tpu.memory_space<vmem>>, %arg14: memref<16x128xf32, #tpu.memory_space<vmem>>) attributes {dimension_semantics = [#tpu.dimension_semantics<parallel>], iteration_bounds = array<i64: 1>, scalar_prefetch = 0 : i64, scratch_operands = 0 : i64, tpu.core_type = #tpu.core_type<tc>, window_params = [{transform_indices = @transform_0, window_bounds = array<i64: 16, 256>}, {transform_indices = @transform_1, window_bounds = array<i64: 16, 1>}, {transform_indices = @transform_2, window_bounds = array<i64: 16, 1>}, {pipeline_mode = #tpu.pipeline_mode<synchronous>, transform_indices = @transform_3, window_bounds = array<i64: 256, 128>}, {pipeline_mode = #tpu.pipeline_mode<synchronous>, transform_indices = @transform_4, window_bounds = array<i64: 1, 128>}, {pipeline_mode = #tpu.pipeline_mode<synchronous>, transform_indices = @transform_5, window_bounds = array<i64: 1, 128>}, {pipeline_mode = #tpu.pipeline_mode<synchronous>, transform_indices = @transform_6, window_bounds = array<i64: 1, 128>}, {pipeline_mode = #tpu.pipeline_mode<synchronous>, transform_indices = @transform_7, window_bounds = array<i64: 128, 256>}, {pipeline_mode = #tpu.pipeline_mode<synchronous>, transform_indices = @transform_8, window_bounds = array<i64: 1, 256>}, {pipeline_mode = #tpu.pipeline_mode<synchronous>, transform_indices = @transform_9, window_bounds = array<i64: 256, 128>}, {pipeline_mode = #tpu.pipeline_mode<synchronous>, transform_indices = @transform_10, window_bounds = array<i64: 1, 128>}, {pipeline_mode = #tpu.pipeline_mode<synchronous>, transform_indices = @transform_11, window_bounds = array<i64: 1, 128>}, {pipeline_mode = #tpu.pipeline_mode<synchronous>, transform_indices = @transform_12, window_bounds = array<i64: 1, 128>}, {transform_indices = @transform_13, window_bounds = array<i64: 16, 128>}]} {
    %c0 = arith.constant 0 : index
    %c0_0 = arith.constant 0 : index
    %0 = vector.load %arg1[%c0, %c0_0] : memref<16x256xbf16, #tpu.memory_space<vmem>>, vector<16x256xbf16>
    %c0_1 = arith.constant 0 : index
    %c0_2 = arith.constant 0 : index
    %1 = vector.load %arg4[%c0_1, %c0_2] : memref<256x128xbf16, #tpu.memory_space<vmem>>, vector<256x128xbf16>
    %cst = arith.constant dense<0.000000e+00> : vector<16x128xf32>
    %2 = tpu.matmul %0, %1, %cst {dimension_numbers = #tpu.dot_dimension_numbers<[1], [0], [0], [1], [0, 0, 1, 1], [], []>} : vector<16x256xbf16>, vector<256x128xbf16>, vector<16x128xf32> -> vector<16x128xf32>
    %c0_3 = arith.constant 0 : index
    %c0_4 = arith.constant 0 : index
    %3 = vector.load %arg5[%c0_3, %c0_4] : memref<1x128xf32, #tpu.memory_space<vmem>>, vector<1x128xf32>
    %4 = vector.broadcast %3 : vector<1x128xf32> to vector<16x128xf32>
    %5 = arith.addf %2, %4 : vector<16x128xf32>
    %c0_5 = arith.constant 0 : index
    %c0_6 = arith.constant 0 : index
    %6 = vector.load %arg2[%c0_5, %c0_6] : memref<16x1xf32, #tpu.memory_space<vmem>>, vector<16x1xf32>
    %c0_7 = arith.constant 0 : index
    %c0_8 = arith.constant 0 : index
    %7 = vector.load %arg6[%c0_7, %c0_8] : memref<1x128xf32, #tpu.memory_space<vmem>>, vector<1x128xf32>
    %8 = vector.broadcast %6 : vector<16x1xf32> to vector<16x128xf32>
    %9 = vector.broadcast %7 : vector<1x128xf32> to vector<16x128xf32>
    %10 = arith.mulf %8, %9 : vector<16x128xf32>
    %11 = arith.addf %5, %10 : vector<16x128xf32>
    %c0_9 = arith.constant 0 : index
    %c0_10 = arith.constant 0 : index
    %12 = vector.load %arg3[%c0_9, %c0_10] : memref<16x1xf32, #tpu.memory_space<vmem>>, vector<16x1xf32>
    %c0_11 = arith.constant 0 : index
    %c0_12 = arith.constant 0 : index
    %13 = vector.load %arg7[%c0_11, %c0_12] : memref<1x128xf32, #tpu.memory_space<vmem>>, vector<1x128xf32>
    %14 = vector.broadcast %12 : vector<16x1xf32> to vector<16x128xf32>
    %15 = vector.broadcast %13 : vector<1x128xf32> to vector<16x128xf32>
    %16 = arith.mulf %14, %15 : vector<16x128xf32>
    %17 = arith.addf %11, %16 : vector<16x128xf32>
    %18 = math.tanh %17 : vector<16x128xf32>
    %19 = arith.truncf %18 : vector<16x128xf32> to vector<16x128xbf16>
    %c0_13 = arith.constant 0 : index
    %c0_14 = arith.constant 0 : index
    %20 = vector.load %arg8[%c0_13, %c0_14] : memref<128x256xbf16, #tpu.memory_space<vmem>>, vector<128x256xbf16>
    %cst_15 = arith.constant dense<0.000000e+00> : vector<16x256xf32>
    %21 = tpu.matmul %19, %20, %cst_15 {dimension_numbers = #tpu.dot_dimension_numbers<[1], [0], [0], [1], [0, 0, 1, 1], [], []>} : vector<16x128xbf16>, vector<128x256xbf16>, vector<16x256xf32> -> vector<16x256xf32>
    %c0_16 = arith.constant 0 : index
    %c0_17 = arith.constant 0 : index
    %22 = vector.load %arg9[%c0_16, %c0_17] : memref<1x256xf32, #tpu.memory_space<vmem>>, vector<1x256xf32>
    %23 = vector.broadcast %22 : vector<1x256xf32> to vector<16x256xf32>
    %24 = arith.addf %21, %23 : vector<16x256xf32>
    %cst_18 = arith.constant 0.000000e+00 : f32
    %25 = vector.broadcast %cst_18 : f32 to vector<16x256xf32>
    %26 = arith.maximumf %24, %25 : vector<16x256xf32>
    %27 = arith.truncf %26 : vector<16x256xf32> to vector<16x256xbf16>
    %c0_19 = arith.constant 0 : index
    %c0_20 = arith.constant 0 : index
    %28 = vector.load %arg10[%c0_19, %c0_20] : memref<256x128xbf16, #tpu.memory_space<vmem>>, vector<256x128xbf16>
    %cst_21 = arith.constant dense<0.000000e+00> : vector<16x128xf32>
    %29 = tpu.matmul %27, %28, %cst_21 {dimension_numbers = #tpu.dot_dimension_numbers<[1], [0], [0], [1], [0, 0, 1, 1], [], []>} : vector<16x256xbf16>, vector<256x128xbf16>, vector<16x128xf32> -> vector<16x128xf32>
    %c0_22 = arith.constant 0 : index
    %c0_23 = arith.constant 0 : index
    %30 = vector.load %arg11[%c0_22, %c0_23] : memref<1x128xf32, #tpu.memory_space<vmem>>, vector<1x128xf32>
    %31 = vector.broadcast %30 : vector<1x128xf32> to vector<16x128xf32>
    %32 = arith.addf %29, %31 : vector<16x128xf32>
    %33 = arith.addf %32, %18 : vector<16x128xf32>
    %cst_24 = arith.constant dense<0.000000e+00> : vector<16xf32>
    %34 = vector.multi_reduction <add>, %33, %cst_24 [1] : vector<16x128xf32> to vector<16xf32>
    %35 = vector.shape_cast %34 : vector<16xf32> to vector<16x1xf32>
    %cst_25 = arith.constant 1.280000e+02 : f32
    %36 = vector.broadcast %cst_25 : f32 to vector<16x1xf32>
    %37 = arith.divf %35, %36 : vector<16x1xf32>
    %38 = vector.broadcast %37 : vector<16x1xf32> to vector<16x128xf32>
    %39 = arith.subf %33, %38 : vector<16x128xf32>
    %40 = arith.mulf %39, %39 : vector<16x128xf32>
    %cst_26 = arith.constant dense<0.000000e+00> : vector<16xf32>
    %41 = vector.multi_reduction <add>, %40, %cst_26 [1] : vector<16x128xf32> to vector<16xf32>
    %42 = vector.shape_cast %41 : vector<16xf32> to vector<16x1xf32>
    %cst_27 = arith.constant 1.270000e+02 : f32
    %43 = vector.broadcast %cst_27 : f32 to vector<16x1xf32>
    %44 = arith.divf %42, %43 : vector<16x1xf32>
    %45 = math.sqrt %44 : vector<16x1xf32>
    %cst_28 = arith.constant 1.000000e-03 : f32
    %46 = vector.broadcast %cst_28 : f32 to vector<16x1xf32>
    %47 = arith.addf %45, %46 : vector<16x1xf32>
    %48 = tpu.reciprocal %47 {approx = true} : vector<16x1xf32> -> vector<16x1xf32>
    %49 = arith.mulf %47, %48 : vector<16x1xf32>
    %cst_29 = arith.constant 2.000000e+00 : f32
    %50 = vector.broadcast %cst_29 : f32 to vector<16x1xf32>
    %51 = arith.subf %50, %49 : vector<16x1xf32>
    %52 = arith.mulf %48, %51 : vector<16x1xf32>
    %53 = vector.broadcast %52 : vector<16x1xf32> to vector<16x128xf32>
    %54 = arith.mulf %39, %53 : vector<16x128xf32>
    %c0_30 = arith.constant 0 : index
    %c0_31 = arith.constant 0 : index
    %55 = vector.load %arg12[%c0_30, %c0_31] : memref<1x128xf32, #tpu.memory_space<vmem>>, vector<1x128xf32>
    %56 = vector.broadcast %55 : vector<1x128xf32> to vector<16x128xf32>
    %57 = arith.mulf %54, %56 : vector<16x128xf32>
    %c0_32 = arith.constant 0 : index
    %c0_33 = arith.constant 0 : index
    %58 = vector.load %arg13[%c0_32, %c0_33] : memref<1x128xf32, #tpu.memory_space<vmem>>, vector<1x128xf32>
    %59 = vector.broadcast %58 : vector<1x128xf32> to vector<16x128xf32>
    %60 = arith.addf %57, %59 : vector<16x128xf32>
    %c0_34 = arith.constant 0 : index
    %c0_35 = arith.constant 0 : index
    %61 = vector.load %arg14[%c0_34, %c0_35] : memref<16x128xf32, #tpu.memory_space<vmem>>, vector<16x128xf32>
    tpu.vector_store %arg14[%c0_34, %c0_35], %60 {strides = array<i32>} : memref<16x128xf32, #tpu.memory_space<vmem>>, vector<16x128xf32>,
    return
  }
  func.func @transform_0(%arg0: i32) -> (i32, i32) {
    %c0_i32 = arith.constant 0 : i32
    %c0_i32_0 = arith.constant 0 : i32
    return %arg0, %c0_i32 : i32, i32
  }
  func.func @transform_1(%arg0: i32) -> (i32, i32) {
    %c0_i32 = arith.constant 0 : i32
    %c0_i32_0 = arith.constant 0 : i32
    return %arg0, %c0_i32 : i32, i32
  }
  func.func @transform_2(%arg0: i32) -> (i32, i32) {
    %c0_i32 = arith.constant 0 : i32
    %c0_i32_0 = arith.constant 0 : i32
    return %arg0, %c0_i32 : i32, i32
  }
  func.func @transform_3(%arg0: i32) -> (i32, i32) {
    %c0_i32 = arith.constant 0 : i32
    %c0_i32_0 = arith.constant 0 : i32
    %c0_i32_1 = arith.constant 0 : i32
    return %c0_i32, %c0_i32_0 : i32, i32
  }
  func.func @transform_4(%arg0: i32) -> (i32, i32) {
    %c0_i32 = arith.constant 0 : i32
    %c0_i32_0 = arith.constant 0 : i32
    %c0_i32_1 = arith.constant 0 : i32
    return %c0_i32, %c0_i32_0 : i32, i32
  }
  func.func @transform_5(%arg0: i32) -> (i32, i32) {
    %c0_i32 = arith.constant 0 : i32
    %c0_i32_0 = arith.constant 0 : i32
    %c0_i32_1 = arith.constant 0 : i32
    return %c0_i32, %c0_i32_0 : i32, i32
  }
  func.func @transform_6(%arg0: i32) -> (i32, i32) {
    %c0_i32 = arith.constant 0 : i32
    %c0_i32_0 = arith.constant 0 : i32
    %c0_i32_1 = arith.constant 0 : i32
    return %c0_i32, %c0_i32_0 : i32, i32
  }
  func.func @transform_7(%arg0: i32) -> (i32, i32) {
    %c0_i32 = arith.constant 0 : i32
    %c0_i32_0 = arith.constant 0 : i32
    %c0_i32_1 = arith.constant 0 : i32
    return %c0_i32, %c0_i32_0 : i32, i32
  }
  func.func @transform_8(%arg0: i32) -> (i32, i32) {
    %c0_i32 = arith.constant 0 : i32
    %c0_i32_0 = arith.constant 0 : i32
    %c0_i32_1 = arith.constant 0 : i32
    return %c0_i32, %c0_i32_0 : i32, i32
  }
  func.func @transform_9(%arg0: i32) -> (i32, i32) {
    %c0_i32 = arith.constant 0 : i32
    %c0_i32_0 = arith.constant 0 : i32
    %c0_i32_1 = arith.constant 0 : i32
    return %c0_i32, %c0_i32_0 : i32, i32
  }
  func.func @transform_10(%arg0: i32) -> (i32, i32) {
    %c0_i32 = arith.constant 0 : i32
    %c0_i32_0 = arith.constant 0 : i32
    %c0_i32_1 = arith.constant 0 : i32
    return %c0_i32, %c0_i32_0 : i32, i32
  }
  func.func @transform_11(%arg0: i32) -> (i32, i32) {
    %c0_i32 = arith.constant 0 : i32
    %c0_i32_0 = arith.constant 0 : i32
    %c0_i32_1 = arith.constant 0 : i32
    return %c0_i32, %c0_i32_0 : i32, i32
  }
  func.func @transform_12(%arg0: i32) -> (i32, i32) {
    %c0_i32 = arith.constant 0 : i32
    %c0_i32_0 = arith.constant 0 : i32
    %c0_i32_1 = arith.constant 0 : i32
    return %c0_i32, %c0_i32_0 : i32, i32
  }
  func.func @transform_13(%arg0: i32) -> (i32, i32) {
    %c0_i32 = arith.constant 0 : i32
    %c0_i32_0 = arith.constant 0 : i32
    return %arg0, %c0_i32 : i32, i32
  }
}

module attributes {stable_mosaic.version = 11 : i64} {
  func.func @head_kernel(%arg0: i32, %arg1: memref<8x128xf32, #tpu.memory_space<vmem>>, %arg2: memref<1x128xf32, #tpu.memory_space<vmem>>, %arg3: memref<128x128xf32, #tpu.memory_space<vmem>>, %arg4: memref<1x128xf32, #tpu.memory_space<vmem>>, %arg5: memref<8x128xf32, #tpu.memory_space<vmem>>) attributes {dimension_semantics = [#tpu.dimension_semantics<parallel>], iteration_bounds = array<i64: 1>, scalar_prefetch = 0 : i64, scratch_operands = 0 : i64, tpu.core_type = #tpu.core_type<tc>, window_params = [{transform_indices = @transform_0, window_bounds = array<i64: 8, 128>}, {pipeline_mode = #tpu.pipeline_mode<synchronous>, transform_indices = @transform_1, window_bounds = array<i64: 1, 128>}, {pipeline_mode = #tpu.pipeline_mode<synchronous>, transform_indices = @transform_2, window_bounds = array<i64: 128, 128>}, {pipeline_mode = #tpu.pipeline_mode<synchronous>, transform_indices = @transform_3, window_bounds = array<i64: 1, 128>}, {transform_indices = @transform_4, window_bounds = array<i64: 8, 128>}]} {
    %c0 = arith.constant 0 : index
    %c0_0 = arith.constant 0 : index
    %0 = vector.load %arg1[%c0, %c0_0] : memref<8x128xf32, #tpu.memory_space<vmem>>, vector<8x128xf32>
    %c0_1 = arith.constant 0 : index
    %c0_2 = arith.constant 0 : index
    %1 = vector.load %arg2[%c0_1, %c0_2] : memref<1x128xf32, #tpu.memory_space<vmem>>, vector<1x128xf32>
    %2 = vector.broadcast %1 : vector<1x128xf32> to vector<8x128xf32>
    %3 = arith.mulf %0, %2 : vector<8x128xf32>
    %cst = arith.constant dense<0.000000e+00> : vector<8xf32>
    %4 = vector.multi_reduction <add>, %3, %cst [1] : vector<8x128xf32> to vector<8xf32>
    %5 = vector.shape_cast %4 : vector<8xf32> to vector<8x1xf32>
    %c0_3 = arith.constant 0 : index
    %c0_4 = arith.constant 0 : index
    %6 = vector.load %arg3[%c0_3, %c0_4] : memref<128x128xf32, #tpu.memory_space<vmem>>, vector<128x128xf32>
    %cst_5 = arith.constant dense<0.000000e+00> : vector<8x128xf32>
    %7 = tpu.matmul %0, %6, %cst_5 {dimension_numbers = #tpu.dot_dimension_numbers<[1], [0], [0], [1], [0, 0, 1, 1], [], []>} : vector<8x128xf32>, vector<128x128xf32>, vector<8x128xf32> -> vector<8x128xf32>
    %c0_6 = arith.constant 0 : index
    %c0_7 = arith.constant 0 : index
    %8 = vector.load %arg4[%c0_6, %c0_7] : memref<1x128xf32, #tpu.memory_space<vmem>>, vector<1x128xf32>
    %9 = vector.broadcast %8 : vector<1x128xf32> to vector<8x128xf32>
    %10 = arith.addf %7, %9 : vector<8x128xf32>
    %cst_8 = arith.constant dense<0xFF800000> : vector<8xf32>
    %11 = vector.multi_reduction <maximumf>, %10, %cst_8 [1] : vector<8x128xf32> to vector<8xf32>
    %12 = vector.shape_cast %11 : vector<8xf32> to vector<8x1xf32>
    %13 = vector.broadcast %12 : vector<8x1xf32> to vector<8x128xf32>
    %14 = arith.subf %10, %13 : vector<8x128xf32>
    %15 = math.exp %14 : vector<8x128xf32>
    %cst_9 = arith.constant dense<0.000000e+00> : vector<8xf32>
    %16 = vector.multi_reduction <add>, %15, %cst_9 [1] : vector<8x128xf32> to vector<8xf32>
    %17 = vector.shape_cast %16 : vector<8xf32> to vector<8x1xf32>
    %18 = math.log %17 : vector<8x1xf32>
    %19 = vector.broadcast %12 : vector<8x1xf32> to vector<8x128xf32>
    %20 = arith.subf %10, %19 : vector<8x128xf32>
    %21 = vector.broadcast %18 : vector<8x1xf32> to vector<8x128xf32>
    %22 = arith.subf %20, %21 : vector<8x128xf32>
    %23 = tpu.iota {dimensions = array<i32: 1>} : vector<8x128xi32>
    %c8_i32 = arith.constant 8 : i32
    %24 = vector.broadcast %c8_i32 : i32 to vector<8x128xi32>
    %25 = arith.cmpi eq, %23, %24 : vector<8x128xi32>
    %26 = vector.shape_cast %5 : vector<8x1xf32> to vector<8x1xf32>
    %27 = vector.broadcast %26 : vector<8x1xf32> to vector<8x128xf32>
    %28 = arith.select %25, %27, %22 : vector<8x128xi1>, vector<8x128xf32>
    %c0_10 = arith.constant 0 : index
    %c0_11 = arith.constant 0 : index
    %29 = vector.load %arg5[%c0_10, %c0_11] : memref<8x128xf32, #tpu.memory_space<vmem>>, vector<8x128xf32>
    tpu.vector_store %arg5[%c0_10, %c0_11], %28 {strides = array<i32>} : memref<8x128xf32, #tpu.memory_space<vmem>>, vector<8x128xf32>,
    return
  }
  func.func @transform_0(%arg0: i32) -> (i32, i32) {
    %c0_i32 = arith.constant 0 : i32
    %c0_i32_0 = arith.constant 0 : i32
    return %arg0, %c0_i32 : i32, i32
  }
  func.func @transform_1(%arg0: i32) -> (i32, i32) {
    %c0_i32 = arith.constant 0 : i32
    %c0_i32_0 = arith.constant 0 : i32
    %c0_i32_1 = arith.constant 0 : i32
    return %c0_i32, %c0_i32_0 : i32, i32
  }
  func.func @transform_2(%arg0: i32) -> (i32, i32) {
    %c0_i32 = arith.constant 0 : i32
    %c0_i32_0 = arith.constant 0 : i32
    %c0_i32_1 = arith.constant 0 : i32
    return %c0_i32, %c0_i32_0 : i32, i32
  }
  func.func @transform_3(%arg0: i32) -> (i32, i32) {
    %c0_i32 = arith.constant 0 : i32
    %c0_i32_0 = arith.constant 0 : i32
    %c0_i32_1 = arith.constant 0 : i32
    return %c0_i32, %c0_i32_0 : i32, i32
  }
  func.func @transform_4(%arg0: i32) -> (i32, i32) {
    %c0_i32 = arith.constant 0 : i32
    %c0_i32_0 = arith.constant 0 : i32
    return %arg0, %c0_i32 : i32, i32
  }
}

</mosaic_0001>

<bundles_post_ra>
// kernel: extractor_forward.3
= control target key start
LH: loop header
LB: loop body
LE: loop exit
PB: predicated region body
PF: predicated region fallthrough
CT: control target
= control target key end

     0   :  { %v200_v0 = vmov 0.0   ;;  %vm201_vm0 = vmmov 0   ;;  %v131_v29 = vlaneseq  ;;  %s287_s2 = inlined_call_operand.vmem [shape: f32[128,128], index: 2, kind: input, shape index: {}]   ;;  %s288_s0 = inlined_call_operand.vmem [shape: f32[8,128], index: 0, kind: input, shape index: {}]   ;;  %s289_s3 = inlined_call_operand.vmem [shape: f32[1,128], index: 3, kind: input, shape index: {}]   ;;  %s290_s1 = inlined_call_operand.vmem [shape: f32[1,128], index: 1, kind: input, shape index: {}]   ;;  %s291_s4 = inlined_call_operand.vmem [shape: f32[8,128], index: 4, kind: output, shape index: {}]  }
   0x1   :  { %159 = vmatprep.subr.mxu0 %v200_v0  ;;  %v43_v1 = vld [vmem:[%s287_s2 + $0x78] sm:$0xff]  ;;  %v42_v2 = vld [vmem:[%s287_s2 + $0x70] sm:$0xff]  ;;  %191 = vmatprep.mubr.msk.f32.mxu0 %vm201_vm0, %v200_v0  ;;  %v41_v3 = vld [vmem:[%s287_s2 + $0x68] sm:$0xff] }
   0x2   :  { %160 = vmatpush3.msra.mxu0 %v43_v1  ;;  %v40_v4 = vld [vmem:[%s287_s2 + $0x60] sm:$0xff]  ;;  %v39_v5 = vld [vmem:[%s287_s2 + $0x58] sm:$0xff]  ;;  %v38_v6 = vld [vmem:[%s287_s2 + $0x50] sm:$0xff]  ;;  %v132_v30 = vand.u32 127, %v131_v29 }
   0x3   :  { %161 = vmatprep.subr.mxu0 %v200_v0  ;;  %v37_v7 = vld [vmem:[%s287_s2 + $0x48] sm:$0xff]  ;;  %v36_v8 = vld [vmem:[%s287_s2 + $0x40] sm:$0xff]  ;;  %v35_v9 = vld [vmem:[%s287_s2 + $0x38] sm:$0xff] }
   0x4   :  { %162 = vmatpush3.msra.mxu0 %v42_v2  ;;  %v34_v10 = vld [vmem:[%s287_s2 + $0x30] sm:$0xff]  ;;  %v33_v11 = vld [vmem:[%s287_s2 + $0x28] sm:$0xff]  ;;  %v32_v12 = vld [vmem:[%s287_s2 + $0x20] sm:$0xff]  ;;  %vm133_vm1 = vcmp.eq.s32.totalorder %v132_v30, 8 }
   0x5   :  { %163 = vmatprep.subr.mxu0 %v200_v0  ;;  %v31_v13 = vld [vmem:[%s287_s2 + $0x18] sm:$0xff]  ;;  %v30_v14 = vld [vmem:[%s287_s2 + $0x10] sm:$0xff]  ;;  %v29_v15 = vld [vmem:[%s287_s2 + $0x8] sm:$0xff] }
   0x6   :  { %164 = vmatpush3.msra.mxu0 %v41_v3  ;;  %v28_v16 = vld [vmem:[%s287_s2] sm:$0xff] }
   0x7   :  { %165 = vmatprep.subr.mxu0 %v200_v0  ;;  %v17_v17 = vld [vmem:[%s288_s0] sm:$0xff] }
   0x8   :  { %166 = vmatpush3.msra.mxu0 %v40_v4  ;;  %v141_v18 = vld [vmem:[%s289_s3] ss:$0 sm:$0xff] }
   0x9   :  { %167 = vmatprep.subr.mxu0 %v200_v0  ;;  %v140_v22 = vld [vmem:[%s290_s1] ss:$0 sm:$0xff] }
   0xa   :  { %168 = vmatpush3.msra.mxu0 %v39_v5  ;;  %v25_v23 = vmul.f32 %v140_v22, %v17_v17 }
   0xb   :  { %169 = vmatprep.subr.mxu0 %v200_v0 }
   0xc   :  { %170 = vmatpush3.msra.mxu0 %v38_v6  ;;  %26 = vadd.xlane.f32.xlu1 %v25_v23 }
   0xd   :  { %171 = vmatprep.subr.mxu0 %v200_v0 }
   0xe   :  { %172 = vmatpush3.msra.mxu0 %v37_v7 }
   0xf   :  { %173 = vmatprep.subr.mxu0 %v200_v0 }
  0x10   :  { %174 = vmatpush3.msra.mxu0 %v36_v8 }
  0x11   :  { %175 = vmatprep.subr.mxu0 %v200_v0 }
  0x12   :  { %176 = vmatpush3.msra.mxu0 %v35_v9 }
  0x13   :  { %177 = vmatprep.subr.mxu0 %v200_v0 }
  0x14   :  { %178 = vmatpush3.msra.mxu0 %v34_v10 }
  0x15   :  { %179 = vmatprep.subr.mxu0 %v200_v0 }
  0x16   :  { %180 = vmatpush3.msra.mxu0 %v33_v11 }
  0x17   :  { %181 = vmatprep.subr.mxu0 %v200_v0 }
  0x18   :  { %182 = vmatpush3.msra.mxu0 %v32_v12 }
  0x19   :  { %183 = vmatprep.subr.mxu0 %v200_v0 }
  0x1a   :  { %184 = vmatpush3.msra.mxu0 %v31_v13 }
  0x1b   :  { %185 = vmatprep.subr.mxu0 %v200_v0 }
  0x1c   :  { %186 = vmatpush3.msra.mxu0 %v30_v14 }
  0x1d   :  { %187 = vmatprep.subr.mxu0 %v200_v0 }
  0x1e   :  { %188 = vmatpush3.msra.mxu0 %v29_v15 }
  0x1f   :  { %189 = vmatprep.subr.mxu0 %v200_v0 }
  0x20   :  { %190 = vmatpush3.msra.mxu0 %v28_v16 }
  0x21   :  { %192 = vmatmul.mubr.f32.vlgmr.msra.gmra.mxu0 %v17_v17 }
  0x95   :  { %v27_v33 = vpop.xlane.xlu1 %26 }
  0xe1   :  { %v117_v19 = vpop.f32.mrf.mxu0 }
  0xe2   :  { %v118_v20 = vadd.f32 %v141_v18, %v117_v19 }
  0xe3   :  { %v193_v21 = vpop.f32.mrf.mxu0 }
  0xe4   :  { %121 = vmax.xlane.f32.xlu0 %v118_v20 }
 0x16d   :  { %v122_v24 = vpop.xlane.xlu0 %121 }
 0x16e   :  { %v123_v25 = vsub.f32 %v118_v20, %v122_v24 }
 0x170   :  { %v124_v26 = vmul.f32 1.442695, %v123_v25 }
 0x172   :  { %196 = vpow2.f32 %v124_v26 }
 0x17f   :  { %v197_v27 = vpop.eup %196 }
 0x180   :  { %126 = vadd.xlane.f32.xlu0 %v197_v27 }
 0x209   :  { %v127_v28 = vpop.xlane.xlu0 %126 }
 0x20a   :  { %198 = vlog2.f32 %v127_v28 }
 0x217   :  { %v199_v31 = vpop.eup %198 }
 0x218   :  { %v129_v32 = vmul.f32 0.6931472, %v199_v31 }
 0x21a   :  { %v130_v34 = vsub.f32 %v123_v25, %v129_v32 }
 0x21c   :  { %v134_v35 = vsel %vm133_vm1, %v27_v33, %v130_v34 }
 0x21d   :  { %135 = vst [vmem:[%s291_s4] sm:$0xff] %v134_v35 }

// kernel: extractor_forward.2
= control target key start
LH: loop header
LB: loop body
LE: loop exit
PB: predicated region body
PF: predicated region fallthrough
CT: control target
= control target key end

     0   :  { %v859_v1 = vmov 0   ;;  %s1119_s3 = inlined_call_operand.vmem [shape: bf16[256,128], index: 3, kind: input, shape index: {}]   ;;  %s1120_s0 = inlined_call_operand.vmem [shape: bf16[16,256], index: 0, kind: input, shape index: {}]   ;;  %s1121_s1 = inlined_call_operand.vmem [shape: f32[16,1], index: 1, kind: input, shape index: {}]   ;;  %s1122_s2 = inlined_call_operand.vmem [shape: f32[16,1], index: 2, kind: input, shape index: {}]   ;;  %s1123_s7 = inlined_call_operand.vmem [shape: bf16[128,256], index: 7, kind: input, shape index: {}]   ;;  %s1124_s9 = inlined_call_operand.vmem [shape: bf16[256,128], index: 9, kind: input, shape index: {}]   ;;  %s1125_s5 = inlined_call_operand.vmem [shape: f32[1,128], index: 5, kind: input, shape index: {}]   ;;  %s1126_s4 = inlined_call_operand.vmem [shape: f32[1,128], index: 4, kind: input, shape index: {}]   ;;  %s1127_s6 = inlined_call_operand.vmem [shape: f32[1,128], index: 6, kind: input, shape index: {}]   ;;  %s1128_s8 = inlined_call_operand.vmem [shape: f32[1,256], index: 8, kind: input, shape index: {}]   ;;  %s1129_s10 = inlined_call_operand.vmem [shape: f32[1,128], index: 10, kind: input, shape index: {}]   ;;  %s1130_s11 = inlined_call_operand.vmem [shape: f32[1,128], index: 11, kind: input, shape index: {}]   ;;  %s1131_s12 = inlined_call_operand.vmem [shape: f32[1,128], index: 12, kind: input, shape index: {}]   ;;  %s1132_s13 = inlined_call_operand.vmem [shape: f32[16,128], index: 13, kind: output, shape index: {}]  }
   0x1   :  { %v788_v0 = vld [vmem:[%s1119_s3 + $0x78] sm:$0xff]   ;;  %786 = vset.pattern.permute.xlu0 %v859_v1  ;;  %787 = vset.pattern.permute.xlu1 %v859_v1  ;;  %v790_v3 = vld [vmem:[%s1119_s3 + $0x70] sm:$0xff]   ;;  %v792_v5 = vld [vmem:[%s1119_s3 + $0x68] sm:$0xff]  }
   0x2   :  { %v789_v2 = vld [vmem:[%s1119_s3 + $0x38] sm:$0xff]   ;;  %422 = vmatprep.mubr.bf16.mxu1 %v859_v1  ;;  %741 = vmatprep.subr.bf16.mxu0 %v788_v0  ;;  %v791_v4 = vld [vmem:[%s1119_s3 + $0x30] sm:$0xff]   ;;  %v793_v6 = vld [vmem:[%s1119_s3 + $0x28] sm:$0xff]  }
   0x3   :  { %742 = vmatpush3.bf16.msra.mxu0 %v789_v2  ;;  %v794_v7 = vld [vmem:[%s1119_s3 + $0x60] sm:$0xff]   ;;  %v796_v9 = vld [vmem:[%s1119_s3 + $0x58] sm:$0xff]   ;;  %v798_v11 = vld [vmem:[%s1119_s3 + $0x50] sm:$0xff]  }
   0x4   :  { %743 = vmatprep.subr.bf16.mxu0 %v790_v3  ;;  %v795_v8 = vld [vmem:[%s1119_s3 + $0x20] sm:$0xff]   ;;  %v797_v10 = vld [vmem:[%s1119_s3 + $0x18] sm:$0xff]   ;;  %v799_v12 = vld [vmem:[%s1119_s3 + $0x10] sm:$0xff]  }
   0x5   :  { %v806_v13 = vld [vmem:[%s1120_s0 + $0x4] ss:$8 sps:$4 sm:$0xff]   ;;  %v807_v18 = vld [vmem:[%s1123_s7 + $0x74] ss:$8 sps:$4 sm:$0xff]   ;;  %v809_v19 = vld [vmem:[%s1123_s7 + $0x70] ss:$8 sps:$4 sm:$0xff]  }
   0x6   :  { %v233_v14 = vld [vmem:[%s1121_s1] sm:$0xff]  ;;  %v234_v16 = vld [vmem:[%s1121_s1 + $0x8] sm:$0xff]  ;;  %224 = vmatprep.mubr.bf16.mxu0 %v806_v13  ;;  %390 = vmatprep.subr.bf16.mxu1 %v807_v18  ;;  %v813_v27 = vld [vmem:[%s1123_s7 + $0x54] ss:$8 sps:$4 sm:$0xff]  }
   0x7   :  { %744 = vmatpush3.bf16.msra.mxu0 %v791_v4  ;;  %v256_v15 = vld [vmem:[%s1122_s2] sm:$0xff]  ;;  %238 = vperm.xlu0 %786, %v233_v14   ;;  %v257_v17 = vld [vmem:[%s1122_s2 + $0x8] sm:$0xff]  ;;  %v815_v28 = vld [vmem:[%s1123_s7 + $0x50] ss:$8 sps:$4 sm:$0xff]  }
   0x8   :  { %745 = vmatprep.subr.bf16.mxu0 %v792_v5  ;;  %261 = vperm.xlu1 %787, %v256_v15   ;;  %v800_v20 = vld [vmem:[%s1119_s3 + $0x48] sm:$0xff]   ;;  %v802_v22 = vld [vmem:[%s1119_s3 + $0x40] sm:$0xff]   ;;  %v819_v31 = vld [vmem:[%s1123_s7 + $0x34] ss:$8 sps:$4 sm:$0xff]  }
   0x9   :  { %v801_v21 = vld [vmem:[%s1119_s3 + $0x8] sm:$0xff]   ;;  %391 = vmatpush1.bf16.msra.mxu1 %v809_v19  ;;  %v803_v23 = vld [vmem:[%s1119_s3] sm:$0xff]   ;;  %v821_v32 = vld [vmem:[%s1123_s7 + $0x30] ss:$8 sps:$4 sm:$0xff]  }
   0xa   :  { %v804_v24 = vld [vmem:[%s1120_s0] ss:$8 sps:$4 sm:$0xff]   ;;  %v810_v25 = vld [vmem:[%s1123_s7 + $0x64] ss:$8 sps:$4 sm:$0xff]   ;;  %v825_v35 = vld [vmem:[%s1123_s7 + $0x14] ss:$8 sps:$4 sm:$0xff]  }
   0xb   :  { %746 = vmatpush3.bf16.msra.mxu0 %v793_v6  ;;  %243 = vperm.xlu0 %786, %v234_v16   ;;  %v812_v26 = vld [vmem:[%s1123_s7 + $0x60] ss:$8 sps:$4 sm:$0xff]   ;;  %v816_v29 = vld [vmem:[%s1123_s7 + $0x44] ss:$8 sps:$4 sm:$0xff]   ;;  %v827_v36 = vld [vmem:[%s1123_s7 + $0x10] ss:$8 sps:$4 sm:$0xff]  }
   0xc   :  { %747 = vmatprep.subr.bf16.mxu0 %v794_v7  ;;  %266 = vperm.xlu1 %787, %v257_v17   ;;  %v818_v30 = vld [vmem:[%s1123_s7 + $0x40] ss:$8 sps:$4 sm:$0xff]   ;;  %v822_v33 = vld [vmem:[%s1123_s7 + $0x24] ss:$8 sps:$4 sm:$0xff]   ;;  %v831_v39 = vld [vmem:[%s1124_s9 + $0x78] sm:$0xff]   ;;  %v300_v17 = vlaneseq }
   0xd   :  { %392 = vmatprep.subr.bf16.mxu1 %v810_v25  ;;  %v824_v34 = vld [vmem:[%s1123_s7 + $0x20] ss:$8 sps:$4 sm:$0xff]   ;;  %v828_v37 = vld [vmem:[%s1123_s7 + $0x4] ss:$8 sps:$4 sm:$0xff]   ;;  %v832_v40 = vld [vmem:[%s1124_s9 + $0x38] sm:$0xff]  }
   0xe   :  { %393 = vmatpush1.bf16.msra.mxu1 %v812_v26  ;;  %v830_v38 = vld [vmem:[%s1123_s7] ss:$8 sps:$4 sm:$0xff]   ;;  %v833_v41 = vld [vmem:[%s1124_s9 + $0x70] sm:$0xff]   ;;  %v839_v47 = vld [vmem:[%s1124_s9 + $0x58] sm:$0xff]   ;;  %v301_v18 = vshrl.u32 %v300_v17, 7 }
   0xf   :  { %748 = vmatpush3.bf16.msra.mxu0 %v795_v8  ;;  %394 = vmatprep.subr.bf16.mxu1 %v813_v27  ;;  %v834_v42 = vld [vmem:[%s1124_s9 + $0x30] sm:$0xff]   ;;  %v835_v43 = vld [vmem:[%s1124_s9 + $0x68] sm:$0xff]   ;;  %v837_v45 = vld [vmem:[%s1124_s9 + $0x60] sm:$0xff]  }
  0x10   :  { %749 = vmatprep.subr.bf16.mxu0 %v796_v9  ;;  %v836_v44 = vld [vmem:[%s1124_s9 + $0x28] sm:$0xff]   ;;  %v838_v46 = vld [vmem:[%s1124_s9 + $0x20] sm:$0xff]   ;;  %v840_v48 = vld [vmem:[%s1124_s9 + $0x18] sm:$0xff]   ;;  %v306_v19 = vsub.s32 1, %v301_v18 }
  0x11   :  { %v704_v49 = vld [vmem:[%s1125_s5] ss:$0 sm:$0xff]  ;;  %v843_v13 = vld [vmem:[%s1124_s9 + $0x48] sm:$0xff]  }
  0x12   :  { %395 = vmatpush1.bf16.msra.mxu1 %v815_v28  ;;  %v685_v53 = vld [vmem:[%s1126_s4] ss:$0 sm:$0xff]  ;;  %v844_v14 = vld [vmem:[%s1124_s9 + $0x8] sm:$0xff]  }
  0x13   :  { %750 = vmatpush3.bf16.msra.mxu0 %v797_v10  ;;  %396 = vmatprep.subr.bf16.mxu1 %v816_v29  ;;  %v705_v56 = vld [vmem:[%s1127_s6] ss:$0 sm:$0xff] }
  0x14   :  { %751 = vmatprep.subr.bf16.mxu0 %v798_v11  ;;  %v841_v11 = vld [vmem:[%s1124_s9 + $0x50] sm:$0xff]   ;;  %v845_v15 = vld [vmem:[%s1124_s9 + $0x40] sm:$0xff]  }
  0x15   :  { %v846_v16 = vld [vmem:[%s1124_s9] sm:$0xff]  }
  0x16   :  { %397 = vmatpush1.bf16.msra.mxu1 %v818_v30 }
  0x17   :  { %752 = vmatpush3.bf16.msra.mxu0 %v799_v12  ;;  %398 = vmatprep.subr.bf16.mxu1 %v819_v31  ;;  %v842_v12 = vld [vmem:[%s1124_s9 + $0x10] sm:$0xff]  }
  0x18   :  { %753 = vmatprep.subr.bf16.mxu0 %v800_v20  ;;  %v302_v20 = vsub.s32 0, %v301_v18  ;;  %v740_v18 = vld [vmem:[%s1131_s12] ss:$0 sm:$0xff] }
  0x1a   :  { %399 = vmatpush1.bf16.msra.mxu1 %v821_v32 }
  0x1b   :  { %754 = vmatpush3.bf16.msra.mxu0 %v801_v21  ;;  %400 = vmatprep.subr.bf16.mxu1 %v822_v33  ;;  %v298_v21 = vld [vmem:[%s1128_s8] sm:$0x3] }
  0x1c   :  { %755 = vmatprep.subr.bf16.mxu0 %v802_v22 }
  0x1e   :  { %401 = vmatpush1.bf16.msra.mxu1 %v824_v34 }
  0x1f   :  { %756 = vmatpush3.bf16.msra.mxu0 %v803_v23  ;;  %402 = vmatprep.subr.bf16.mxu1 %v825_v35  ;;  %v307_v23 = vrot.slane %v298_v21, %v306_v19 }
  0x20   :  { %763 = vmatprep.subr.bf16.mxu0 %v831_v39  ;;  %v722_v39 = vld [vmem:[%s1129_s10] ss:$0 sm:$0xff] }
  0x22   :  { %225 = vmatmul.mubr.bf16.vlgmr.msra.gmra.mxu0 %v804_v24  ;;  %403 = vmatpush1.bf16.msra.mxu1 %v827_v36  ;;  %v303_v24 = vrot.slane %v298_v21, %v302_v20 }
  0x23   :  { %404 = vmatprep.subr.bf16.mxu1 %v828_v37  ;;  %764 = vmatpush3.bf16.msra.mxu0 %v832_v40 }
  0x24   :  { %765 = vmatprep.subr.bf16.mxu0 %v833_v41 }
  0x26   :  { %405 = vmatpush1.bf16.msra.mxu1 %v830_v38 }
  0x27   :  { %766 = vmatpush3.bf16.msra.mxu0 %v834_v42 }
  0x28   :  { %767 = vmatprep.subr.bf16.mxu0 %v835_v43 }
  0x2b   :  { %768 = vmatpush3.bf16.msra.mxu0 %v836_v44 }
  0x2c   :  { %769 = vmatprep.subr.bf16.mxu0 %v837_v45 }
  0x2f   :  { %770 = vmatpush3.bf16.msra.mxu0 %v838_v46 }
  0x30   :  { %771 = vmatprep.subr.bf16.mxu0 %v839_v47 }
  0x33   :  { %772 = vmatpush3.bf16.msra.mxu0 %v840_v48 }
  0x34   :  { %773 = vmatprep.subr.bf16.mxu0 %v841_v11 }
  0x37   :  { %774 = vmatpush3.bf16.msra.mxu0 %v842_v12 }
  0x38   :  { %775 = vmatprep.subr.bf16.mxu0 %v843_v13 }
  0x3b   :  { %776 = vmatpush3.bf16.msra.mxu0 %v844_v14 }
  0x3c   :  { %777 = vmatprep.subr.bf16.mxu0 %v845_v15  ;;  %v739_v15 = vld [vmem:[%s1130_s11] ss:$0 sm:$0xff] }
  0x3f   :  { %778 = vmatpush3.bf16.msra.mxu0 %v846_v16 }
  0x82   :  { %v239_v50 = vpop.permute.xlu0 %238 }
  0x83   :  { %v262_v52 = vpop.permute.xlu1 %261  ;;  %v252_v55 = vmul.f32 %v704_v49, %v239_v50 }
  0x84   :  { %v275_v60 = vmul.f32 %v705_v56, %v262_v52 }
  0x86   :  { %v244_v61 = vpop.permute.xlu0 %243 }
  0x87   :  { %v267_v1 = vpop.permute.xlu1 %266  ;;  %v253_v2 = vmul.f32 %v704_v49, %v244_v61 }
  0x88   :  { %v276_v5 = vmul.f32 %v705_v56, %v267_v1 }
  0xe2   :  { %v757_v51 = vpop.f32.mrf.mxu0 }
  0xe4   :  { %v758_v54 = vpop.f32.mrf.mxu0 }
  0xe5   :  { %v759_v57 = vadd.f32 %v758_v54, %v757_v51 }
  0xe6   :  { %v760_v58 = vpop.f32.mrf.mxu0 }
  0xe7   :  { %v227_v59 = vadd.f32 %v759_v57, %v685_v53 }
  0xe8   :  { %v761_v62 = vpop.f32.mrf.mxu0 }
  0xe9   :  { %v254_v63 = vadd.f32 %v252_v55, %v227_v59  ;;  %v762_v0 = vadd.f32 %v761_v62, %v760_v58 }
  0xeb   :  { %v230_v3 = vadd.f32 %v762_v0, %v685_v53  ;;  %v277_v4 = vadd.f32 %v275_v60, %v254_v63 }
  0xed   :  { %v255_v6 = vadd.f32 %v253_v2, %v230_v3  ;;  %847 = vtanh.f32 %v277_v4 }
  0xef   :  { %v278_v7 = vadd.f32 %v276_v5, %v255_v6 }
  0xf1   :  { %849 = vtanh.f32 %v278_v7 }
  0xfa   :  { %v848_v8 = vpop.eup %847 }
  0xfe   :  { %v850_v9 = vpop.eup %849 }
  0xff   :  { %v281_v10 = vpack.c.bf16 %v850_v9, %v848_v8 }
 0x101   :  { %423 = vmatmul.mubr.bf16.vlgmr.msra.gmra.mxu1 %v281_v10 }
 0x1c1   :  { %v424_v22 = vpop.f32.mrf.mxu1 }
 0x1c2   :  { %v425_v29 = vadd.f32 %v424_v22, %v303_v24 }
 0x1c3   :  { %v426_v25 = vpop.f32.mrf.mxu1 }
 0x1c4   :  { %v427_v27 = vadd.f32 %v426_v25, %v307_v23  ;;  %v433_v35 = vmax.f32 %v425_v29, 0.0 }
 0x1c5   :  { %v428_v26 = vpop.f32.mrf.mxu1 }
 0x1c6   :  { %v429_v28 = vadd.f32 %v428_v26, %v303_v24  ;;  %v434_v33 = vmax.f32 %v427_v27, 0.0 }
 0x1c7   :  { %v430_v30 = vpop.f32.mrf.mxu1 }
 0x1c8   :  { %v431_v31 = vadd.f32 %v430_v30, %v307_v23  ;;  %v435_v32 = vmax.f32 %v429_v28, 0.0 }
 0x1ca   :  { %v436_v34 = vmax.f32 %v431_v31, 0.0  ;;  %v437_v37 = vpack.c.bf16 %v435_v32, %v433_v35 }
 0x1cc   :  { %v438_v36 = vpack.c.bf16 %v436_v34, %v434_v33 }
 0x1ce   :  { %606 = vmatprep.mubr.bf16.mxu0 %v438_v36 }
 0x1cf   :  { %607 = vmatmul.mubr.bf16.vlgmr.msra.gmra.mxu0 %v437_v37 }
 0x28f   :  { %v779_v38 = vpop.f32.mrf.mxu0 }
 0x291   :  { %v780_v40 = vpop.f32.mrf.mxu0 }
 0x292   :  { %v781_v41 = vadd.f32 %v780_v40, %v779_v38 }
 0x293   :  { %v782_v42 = vpop.f32.mrf.mxu0 }
 0x294   :  { %v609_v43 = vadd.f32 %v781_v41, %v722_v39 }
 0x295   :  { %v783_v44 = vpop.f32.mrf.mxu0 }
 0x296   :  { %v784_v45 = vadd.f32 %v783_v44, %v782_v42  ;;  %v615_v46 = vadd.f32 %v848_v8, %v609_v43 }
 0x298   :  { %v612_v47 = vadd.f32 %v784_v45, %v722_v39  ;;  %617 = vadd.xlane.f32.xlu0 %v615_v46 }
 0x29a   :  { %v616_v48 = vadd.f32 %v850_v9, %v612_v47 }
 0x29c   :  { %619 = vadd.xlane.f32.xlu1 %v616_v48 }
 0x321   :  { %v618_v49 = vpop.xlane.xlu0 %617 }
 0x322   :  { %v622_v50 = vmul.f32 0.0078125, %v618_v49 }
 0x324   :  { %v624_v51 = vsub.f32 %v615_v46, %v622_v50 }
 0x325   :  { %v620_v52 = vpop.xlane.xlu1 %619 }
 0x326   :  { %v623_v53 = vmul.f32 0.0078125, %v620_v52  ;;  %v626_v54 = vmul.f32 %v624_v51, %v624_v51 }
 0x328   :  { %v625_v55 = vsub.f32 %v616_v48, %v623_v53  ;;  %628 = vadd.xlane.f32.xlu0 %v626_v54 }
 0x32a   :  { %v627_v56 = vmul.f32 %v625_v55, %v625_v55 }
 0x32c   :  { %630 = vadd.xlane.f32.xlu0 %v627_v56 }
 0x3b1   :  { %v629_v57 = vpop.xlane.xlu0 %628 }
 0x3b2   :  { %v633_v58 = vmul.f32 0.007874016, %v629_v57 }
 0x3b4   :  { %851 = vrsqrt.f32 %v633_v58  ;;  %vm637_vm0 = vcmp.eq.f32.partialorder %v633_v58, inf  ;;  %v640_v63 = vand.u32 2147483648, %v633_v58  ;;  %vm639_vm1 = vcmp.eq.f32.partialorder %v633_v58, 0.0 }
 0x3b5   :  { %v631_v59 = vpop.xlane.xlu0 %630 }
 0x3b6   :  { %v634_v60 = vmul.f32 0.007874016, %v631_v59 }
 0x3b8   :  { %853 = vrsqrt.f32 %v634_v60  ;;  %vm644_vm2 = vcmp.eq.f32.partialorder %v634_v60, inf  ;;  %v647_v5 = vand.u32 2147483648, %v634_v60  ;;  %vm646_vm3 = vcmp.eq.f32.partialorder %v634_v60, 0.0 }
 0x3c1   :  { %v852_v61 = vpop.eup %851 }
 0x3c2   :  { %v636_v62 = vmul.f32 %v852_v61, %v633_v58 }
 0x3c4   :  { %v638_v0 = vsel %vm637_vm0, %v633_v58, %v636_v62 }
 0x3c5   :  { %v854_v1 = vpop.eup %853  ;;  %v641_v2 = vsel %vm639_vm1, %v640_v63, %v638_v0 }
 0x3c6   :  { %v649_v3 = vadd.f32 0.001, %v641_v2  ;;  %v643_v4 = vmul.f32 %v854_v1, %v634_v60 }
 0x3c8   :  { %855 = vrcp.f32 %v649_v3  ;;  %v645_v6 = vsel %vm644_vm2, %v634_v60, %v643_v4 }
 0x3c9   :  { %v648_v7 = vsel %vm646_vm3, %v647_v5, %v645_v6 }
 0x3ca   :  { %v650_v8 = vadd.f32 0.001, %v648_v7 }
 0x3cc   :  { %857 = vrcp.f32 %v650_v8 }
 0x3d5   :  { %v856_v9 = vpop.eup %855 }
 0x3d6   :  { %v653_v10 = vmul.f32 %v856_v9, %v649_v3 }
 0x3d8   :  { %v655_v11 = vsub.f32 2.0, %v653_v10 }
 0x3d9   :  { %v858_v12 = vpop.eup %857 }
 0x3da   :  { %v657_v13 = vmul.f32 %v856_v9, %v655_v11  ;;  %v654_v14 = vmul.f32 %v858_v12, %v650_v8 }
 0x3dc   :  { %v659_v16 = vmul.f32 %v657_v13, %v624_v51  ;;  %v656_v17 = vsub.f32 2.0, %v654_v14 }
 0x3de   :  { %v668_v19 = vmul.f32 %v739_v15, %v659_v16  ;;  %v658_v20 = vmul.f32 %v858_v12, %v656_v17 }
 0x3e0   :  { %v677_v21 = vadd.f32 %v740_v18, %v668_v19  ;;  %v660_v22 = vmul.f32 %v658_v20, %v625_v55 }
 0x3e2   :  { %679 = vst [vmem:[%s1132_s13] sm:$0xff] %v677_v21  ;;  %v669_v23 = vmul.f32 %v739_v15, %v660_v22 }
 0x3e4   :  { %v678_v24 = vadd.f32 %v740_v18, %v669_v23 }
 0x3e6   :  { %680 = vst [vmem:[%s1132_s13 + $0x8] sm:$0xff] %v678_v24 }

</bundles_post_ra>
